<compile_context>
chip_gen: v5e
topology: v5e:2x2
jax: 0.10.0
libtpu: 0.0.40
codegen_flags: <defaults>
</compile_context>

<pallas_src>
import functools

import jax
import jax.numpy as jnp
from jax.experimental import pallas as pl
from jax.experimental.pallas import tpu as pltpu


def _int_pow(x, p: int):
    """x**p for static positive integer p via repeated multiplies (VPU only)."""
    result = None
    base = x
    while p > 0:
        if p & 1:
            result = base if result is None else result * base
        p >>= 1
        if p:
            base = base * base
    return result


def _vmem_budgets():
    """(tile working-set budget, scoped vmem limit) in bytes, per generation."""
    phys = 64 << 20  # conservative default: v7x per-TensorCore VMEM
    try:
        info = pltpu.get_tpu_info()
        phys = int(getattr(info, "vmem_capacity_bytes", phys)) or phys
    except Exception:
        pass
    if phys >= (128 << 20):
        # v5e / v6e: 128 MiB physical — use it instead of leaving ~100 MiB idle.
        return 64 << 20, 96 << 20
    # v7x (64 MiB per TC) or unknown smaller part.
    limit = min(48 << 20, (phys * 3) // 4)
    budget = max(16 << 20, limit - (16 << 20))
    return budget, limit


def _pick_row_tile(rows: int, d: int, itemsize: int, tile_budget: int) -> int:
    """Largest row tile whose full working set fits the byte budget.

    Working set per row =
        (in + out) tiles x 2 pipeline buffers at native dtype   -> 4*d*itemsize
      + in-kernel f32 intermediates (upcast / squared / scaled)  -> 2*d*4
    """
    per_row = 2 * 2 * d * itemsize + 2 * d * 4
    tr = max(tile_budget // per_row, 1)
    # Guarantee >= 2 grid steps so both v7x TensorCores get work; on 1-TC chips
    # the extra step costs ~0.35 us, i.e. noise for a mem-bound kernel.
    if rows >= 16:
        tr = min(tr, max(8, ((rows // 2) // 8) * 8))
    if tr >= rows:
        return rows                    # full extent: always a legal block shape
    return max(8, (tr // 8) * 8)       # keep the sublane dim a multiple of 8


def _normalize_kernel(x_ref, o_ref, *, power):
    # x_ref / o_ref: (TR, D) tile in VMEM.  Reduction runs along the lane axis.
    # Read 1: reduction in f32.
    xf = x_ref[...].astype(jnp.float32)
    if power == 2:
        # Hot path: square + lane-reduce + exact sqrt.
        s = jnp.sum(xf * xf, axis=-1, keepdims=True)
        norm = jnp.sqrt(s)
    elif isinstance(power, int) and power > 0:
        # Small integer powers: repeated VPU multiplies; jnp.power only for 1/p.
        s = jnp.sum(_int_pow(xf, power), axis=-1, keepdims=True)
        norm = jnp.power(s, 1.0 / power)
    else:
        s = jnp.sum(jnp.power(xf, power), axis=-1, keepdims=True)
        norm = jnp.power(s, 1.0 / power)

    # Reciprocal + multiply instead of divide (approx=False keeps the result
    # within 1e-5 of x / (norm + eps)).
    inv = pl.reciprocal(norm + 1e-7, approx=False)       # (TR, 1) f32

    # Read 2: re-read the tile for the scale (keeps the native-dtype tile from
    # staying live across the reduce).  Multiply in f32, cast only at the store
    # so bf16 inputs don't quantize the per-row reciprocal before the scale.
    o_ref[...] = (x_ref[...].astype(jnp.float32) * inv).astype(o_ref.dtype)


def normalize(x: jax.Array, power: int = 2) -> jax.Array:
    """Pallas equivalent of Normalize(power).forward(x) for x of shape [B, N, D]."""
    B, N, D = x.shape
    rows = B * N
    x2 = x.reshape(rows, D)              # free: row-major reshape

    itemsize = jnp.dtype(x.dtype).itemsize
    tile_budget, vmem_limit = _vmem_budgets()
    tr = _pick_row_tile(rows, D, itemsize, tile_budget)
    grid = (pl.cdiv(rows, tr),)

    kernel = functools.partial(_normalize_kernel, power=power)

    # Advisory cost: ~3 flops/elem (pow + reduce-add + scale), one rsqrt-class
    # transcendental per row, read + write of the full tensor.
    cost = pl.CostEstimate(
        flops=3 * rows * D,
        transcendentals=rows,
        bytes_accessed=2 * rows * D * itemsize,
    )

    out = pl.pallas_call(
        kernel,
        out_shape=jax.ShapeDtypeStruct((rows, D), x.dtype),
        grid_spec=pltpu.PrefetchScalarGridSpec(
            num_scalar_prefetch=0,
            grid=grid,
            in_specs=[pl.BlockSpec((tr, D), lambda i: (i, 0))],
            out_specs=pl.BlockSpec((tr, D), lambda i: (i, 0)),
        ),
        compiler_params=pltpu.CompilerParams(
            dimension_semantics=("parallel",),
            vmem_limit_bytes=vmem_limit,
        ),
        cost_estimate=cost,
    )(x2)
    return out.reshape(B, N, D)


def _reference(x: jax.Array, power: int = 2) -> jax.Array:
    xf = x.astype(jnp.float32)
    norm = jnp.power(jnp.sum(jnp.power(xf, power), axis=2, keepdims=True), 1.0 / power)
    return (xf / (norm + 1e-7)).astype(x.dtype)


if __name__ == "__main__":
    key = jax.random.PRNGKey(0)

    # batch=2, seq=8, hidden=32 (dim=2 of the PyTorch input is the hidden axis).
    x = jax.random.normal(key, (2, 8, 32), dtype=jnp.float32)
    out = jax.block_until_ready(normalize(x, power=2))
    ref = _reference(x, power=2)
    assert out.shape == x.shape and out.dtype == x.dtype
    assert jnp.allclose(out, ref, atol=1e-5, rtol=1e-5), "mismatch vs reference (D=32)"

    # Lane-dense (D multiple of 128) sanity check — the production path.
    x2 = jax.random.normal(jax.random.PRNGKey(0), (2, 8, 128), dtype=jnp.float32)
    out2 = jax.block_until_ready(normalize(x2, power=2))
    ref2 = _reference(x2, power=2)
    assert jnp.allclose(out2, ref2, atol=1e-5, rtol=1e-5), "mismatch vs reference (D=128)"

    # bf16 smoke test: f32 scale + cast-at-store should track the reference.
    x3 = jax.random.normal(jax.random.PRNGKey(1), (2, 8, 128), dtype=jnp.bfloat16)
    out3 = jax.block_until_ready(normalize(x3, power=2))
    ref3 = _reference(x3, power=2)
    assert out3.dtype == jnp.bfloat16
    assert jnp.allclose(out3.astype(jnp.float32), ref3.astype(jnp.float32),
                        atol=1e-2, rtol=1e-2), "mismatch vs reference (bf16)"

    print("KERNEL_OK")
</pallas_src>

<mosaic_0001>
module attributes {stable_mosaic.version = 11 : i64} {
  func.func @_normalize_kernel(%arg0: i32, %arg1: memref<8x32xf32, #tpu.memory_space<vmem>>, %arg2: memref<8x32xf32, #tpu.memory_space<vmem>>) attributes {dimension_semantics = [#tpu.dimension_semantics<parallel>], iteration_bounds = array<i64: 2>, scalar_prefetch = 0 : i64, scratch_operands = 0 : i64, tpu.core_type = #tpu.core_type<tc>, window_params = [{transform_indices = @transform_0, window_bounds = array<i64: 8, 32>}, {transform_indices = @transform_1, window_bounds = array<i64: 8, 32>}]} {
    %c0 = arith.constant 0 : index
    %c0_0 = arith.constant 0 : index
    %0 = vector.load %arg1[%c0, %c0_0] : memref<8x32xf32, #tpu.memory_space<vmem>>, vector<8x32xf32>
    %1 = arith.mulf %0, %0 : vector<8x32xf32>
    %cst = arith.constant dense<0.000000e+00> : vector<8xf32>
    %2 = vector.multi_reduction <add>, %1, %cst [1] : vector<8x32xf32> to vector<8xf32>
    %3 = vector.shape_cast %2 : vector<8xf32> to vector<8x1xf32>
    %4 = math.sqrt %3 : vector<8x1xf32>
    %cst_1 = arith.constant 1.000000e-07 : f32
    %5 = vector.broadcast %cst_1 : f32 to vector<8x1xf32>
    %6 = arith.addf %4, %5 : vector<8x1xf32>
    %7 = tpu.reciprocal %6 : vector<8x1xf32> -> vector<8x1xf32>
    %c0_2 = arith.constant 0 : index
    %c0_3 = arith.constant 0 : index
    %8 = vector.load %arg1[%c0_2, %c0_3] : memref<8x32xf32, #tpu.memory_space<vmem>>, vector<8x32xf32>
    %9 = vector.broadcast %7 : vector<8x1xf32> to vector<8x32xf32>
    %10 = arith.mulf %8, %9 : vector<8x32xf32>
    %c0_4 = arith.constant 0 : index
    %c0_5 = arith.constant 0 : index
    %11 = vector.load %arg2[%c0_4, %c0_5] : memref<8x32xf32, #tpu.memory_space<vmem>>, vector<8x32xf32>
    tpu.vector_store %arg2[%c0_4, %c0_5], %10 {strides = array<i32>} : memref<8x32xf32, #tpu.memory_space<vmem>>, vector<8x32xf32>,
    return
  }
  func.func @transform_0(%arg0: i32) -> (i32, i32) {
    %c0_i32 = arith.constant 0 : i32
    %c0_i32_0 = arith.constant 0 : i32
    return %arg0, %c0_i32 : i32, i32
  }
  func.func @transform_1(%arg0: i32) -> (i32, i32) {
    %c0_i32 = arith.constant 0 : i32
    %c0_i32_0 = arith.constant 0 : i32
    return %arg0, %c0_i32 : i32, i32
  }
}

</mosaic_0001>

<bundles_post_ra>
// kernel: tpu_custom_call.1
= control target key start
LH: loop header
LB: loop body
LE: loop exit
PB: predicated region body
PF: predicated region fallthrough
CT: control target
= control target key end

     0   :  { %6 = vsyncpa [#allocation3], 0  ;;  %s558_s0 = inlined_call_operand.hbm [shape: f32[16,32], index: 0, kind: input, shape index: {}]   ;;  %s559_s1 = inlined_call_operand.hbm [shape: f32[16,32], index: 1, kind: output, shape index: {}]  }
   0x1   :  { %8 = vsyncpa [#allocation3 + $0x1], 0 }
   0x2   :  { %9 = vsyncpa [#allocation4], 0 }
   0x3   :  { %11 = vsyncpa [#allocation4 + $0x1], 0  ;;  %s425_s6 = smov 0   ;;  %s427_s7 = smov 0  }
   0x4   :  { %s429_s8 = smov 0   ;;  %s431_s9 = smov 0  }
   0x5 LB: > { %s446_s10 = sadd.s32 4294967295, %s413_s9   ;;  %s255_s11 = sadd.s32 4294967294, %s413_s9   ;;  %s413_s9 = sphi %s431_s9, %s569_s9   ;;  %s409_s8 = sphi %s429_s8, %s568_s8   ;;  %s405_s7 = sphi %s427_s7, %s567_s7   ;;  %s401_s6 = sphi %s425_s6, %s566_s6  }
   0x6   : > { %s450_s12 = sadd.s32 1, %s413_s9   ;;  %s24_s13 = sadd.s32 1, %s409_s8 }
   0x7   : > { %s21_s14 = ssub.s32 %s413_s9, %s450_s12  ;;  %p31_p0 = scmp.ne.s32.totalorder %s409_s8, %s405_s7 }
   0x8   : > { %p22_p1 = scmp.eq.s32.totalorder %s21_s14, 0  ;;  %p32_p2 = scmp.eq.s32.totalorder %s413_s9, 0 }
   0x9   : > { %p37_p3 = scmp.ne.s32.totalorder %s405_s7, %s401_s6  ;;  %p38_p4 = scmp.eq.s32.totalorder %s446_s10, 0 }
   0xa   : > { %s462_s15 = scalar_select %p22_p1, %s409_s8, %s24_s13  }
   0xb   : > { %p464_p5 = por %p32_p2, %p31_p0  ;;  %p468_p6 = por %p38_p4, %p37_p3 }
   0xc   : > { %p61_p7 = scmp.eq.s32.totalorder %s446_s10, 1  ;;  %p67_p8 = scmp.eq.s32.totalorder %s255_s11, 1 }
   0xd   : > { %p279_p10 = scmp.lt.s32.totalorder %s413_s9, 2  ;;  %s87_s20 = sand.u32 1, %s409_s8  }
   0xe   : > { %p475_p11 = por %p61_p7, %p31_p0  ;;  %p479_p12 = por %p67_p8, %p37_p3 }
   0xf   : > { %s259_s21 = sshll.u32 %s413_s9, 3  ;;  %s258_s22 = sshll.u32 %s87_s20, 3 }
  0x10   : > { %s95_s25 = scalar_lea.hbm %s558_s0, %s259_s21  ;;  %s91_s27 = scalar_lea.vmem [#allocation2], %s258_s22 }
  0x11   : > { %s97_s26 = sshll.u32 %s95_s25, 4  ;;  %s99_s28 = sshll.u32 %s91_s27, 4  ;;  %s98_s26 = int_to_ptr.hbm [resolvable:$true] %s97_s26  ;;  %s100_s28 = int_to_ptr.vmem [resolvable:$true] %s99_s28 }
  0x12   : > { %p490_p13 = pnand %p279_p10, %p464_p5  ;;  %p260_p0 = scmp.ge.s32.totalorder %s413_s9, 1 }
  0x13   : > { %p104_p1 = scmp.lt.s32.totalorder %s413_s9, 3  ;;  %s88_s30 = scalar_lea.sflag [#allocation3], %s87_s20 }
  0x14   : > { %s317_s2 = sshra.s32 %s98_s26, 4  ;;  %p321_p3 = pneg %p490_p13  ;;  %s318_s2 = int_to_ptr.hbm [resolvable:$true] %s317_s2 }
  0x15   : > { %s319_s3 = scalar_lea.hbm %s318_s2, 8  ;;  %s324_s11 = scalar_lea.hbm %s558_s0, 16 }
  0x16   : > { %p320_p2 = scmp.ne.s32.totalorder %s318_s2, %s319_s3  ;;  %p325_p5 = scmp.lt.s32.totalorder %s318_s2, %s558_s0 }
  0x17   : > { %p326_p8 = scmp.lt.s32.totalorder %s324_s11, %s319_s3 }
  0x18   : > { %p322_p4 = pnand %p321_p3, %p320_p2 }
  0x19   : > { %p327_p10 = por %p326_p8, %p325_p5 }
  0x1a   : > { %p323_p7 = pneg %p322_p4 }
  0x1c   : > { %p328_p9 = pnand %p327_p10, %p323_p7 }
  0x1e   : > { %331 = shalt.err (!%p328_p9)
}
  0x1f   : > { %274 = dma.hbm_to_vmem [thread:$0]  (!%p490_p13), %s98_s26, 128, %s100_s28, %s88_s30  }
  0x20   : > { %p105_p2 = pnand %p260_p0, %p104_p1 }
  0x21   : > { %s511_s16 = sand.u32 (!%p105_p2), 1, %s405_s7  }
  0x22   : > { %108 = sbr.rel (%p105_p2) target bundleno = 205 (0xcd), region = 24  ;;  %s261_s20 = sshll.u32 (!%p105_p2), %s511_s16, 3 }
  0x23   : > { %s111_s21 = scalar_lea.sflag (!%p105_p2), [#allocation3], %s511_s16  ;;  %s114_s22 = scalar_lea.vmem (!%p105_p2), [#allocation2], %s261_s20 }
  0x27   : > { %392 = dma.done.wait (%p468_p6), %s111_s21, 128  }
  0x28   : > { %394 = vsyncadd (%p468_p6), %s111_s21, 4294967168  ;;  %v134_v0 = vld [vmem:[%s114_s22] sm:$0xff]  ;;  %vm136_vm0 = vcmask 261120   ;;  %s264_s17 = sshll.u32 %s446_s10, 3  ;;  %s133_s26 = scalar_lea.vmem [#allocation5], %s261_s20 }
  0x29   : > { %v135_v1 = vmul.f32 %v134_v0, %v134_v0  ;;  %s180_s25 = scalar_lea.hbm %s559_s1, %s264_s17  ;;  %s182_s27 = sshll.u32 %s133_s26, 4  ;;  %s183_s27 = int_to_ptr.vmem [resolvable:$true] %s182_s27 }
  0x2a   : > { %s184_s28 = sshll.u32 %s180_s25, 4  ;;  %s170_s10 = scalar_lea.sflag [#allocation4], %s511_s16  ;;  %s185_s28 = int_to_ptr.hbm [resolvable:$true] %s184_s28 }
  0x2b   : > { %v137_v2 = vsel %vm136_vm0, %v135_v1, 0.0  ;;  %s361_s29 = sshra.s32 %s185_s28, 4  ;;  %s367_s4 = scalar_lea.hbm %s559_s1, 16  ;;  %s362_s29 = int_to_ptr.hbm [resolvable:$true] %s361_s29 }
  0x2c   : > { %138 = vadd.xlane.f32.xlu0 %v137_v2  ;;  %s363_s30 = scalar_lea.hbm %s362_s29, 8  ;;  %p368_p0 = scmp.lt.s32.totalorder %s362_s29, %s559_s1 }
  0x2d   : > { %p364_p6 = scmp.ne.s32.totalorder %s362_s29, %s363_s30  ;;  %p369_p1 = scmp.lt.s32.totalorder %s367_s4, %s363_s30 }
  0x2f   : > { %p365_p9 = pnand %p364_p6, %p475_p11  ;;  %p370_p3 = por %p369_p1, %p368_p0 }
  0x31   : > { %p366_p13 = pneg %p365_p9 }
  0x33   : > { %p371_p4 = pnand %p370_p3, %p366_p13 }
  0x9f   : > { %v139_v3 = vpop.xlane.xlu0 %138 }
  0xa0   : > { %313 = vrsqrt.f32 %v139_v3  ;;  %vm147_vm1 = vcmp.eq.f32.partialorder %v139_v3, inf  ;;  %v150_v11 = vand.u32 2147483648, %v139_v3  ;;  %vm149_vm2 = vcmp.eq.f32.partialorder %v139_v3, 0.0 }
  0xa6   : > { %v314_v4 = vpop.eup %313 }
  0xa7   : > { %v141_v5 = vmul.f32 %v314_v4, %v139_v3 }
  0xa9   : > { %v142_v6 = vmul.f32 %v314_v4, %v141_v5 }
  0xab   : > { %v143_v7 = vmul.f32 0.5, %v142_v6 }
  0xad   : > { %v144_v8 = vsub.f32 1.5, %v143_v7 }
  0xaf   : > { %v145_v9 = vmul.f32 %v314_v4, %v144_v8 }
  0xb1   : > { %v146_v10 = vmul.f32 %v145_v9, %v139_v3 }
  0xb3   : > { %v148_v12 = vsel %vm147_vm1, %v139_v3, %v146_v10 }
  0xb4   : > { %v151_v13 = vsel %vm149_vm2, %v150_v11, %v148_v12 }
  0xb5   : > { %v152_v14 = vadd.f32 1e-07, %v151_v13 }
  0xb7   : > { %315 = vrcp.f32 %v152_v14  ;;  %v164_v18 = vand.u32 2147483648, %v152_v14  ;;  %v162_v20 = vand.u32 2147483647, %v152_v14  ;;  %vm158_vm4 = vweird.f32 %v152_v14 }
  0xb9   : > { %v165_v22 = vor.u32 1.1754944e-38, %v164_v18  ;;  %vm163_vm6 = vcmp.eq.f32.partialorder %v162_v20, 8.507059e+37 }
  0xbd   : > { %v316_v15 = vpop.eup %315 }
  0xbe   : > { %v154_v16 = vmul.f32 %v316_v15, %v152_v14  ;;  %vm159_vm3 = vweird.f32 %v316_v15 }
  0xbf   : > { %vm160_vm5 = vmor %vm158_vm4, %vm159_vm3 }
  0xc0   : > { %v155_v17 = vsub.f32 1.0, %v154_v16 }
  0xc2   : > { %v156_v19 = vmul.f32 %v316_v15, %v155_v17 }
  0xc4   : > { %v157_v21 = vadd.f32 %v316_v15, %v156_v19 }
  0xc6   : > { %v161_v23 = vsel %vm160_vm5, %v316_v15, %v157_v21 }
  0xc7   : > { %v166_v24 = vsel %vm163_vm6, %v165_v22, %v161_v23 }
  0xc8   : > { %v167_v25 = vmul.f32 %v166_v24, %v134_v0 }
  0xca   : > { %168 = vst.msk [vmem:[%s133_s26] sm:$0xff] %vm136_vm0, %v167_v25 }
  0xcb   : > { %374 = shalt.err (!%p371_p4)
}
  0xcc   : > { %269 = dma.vmem_to_hbm [thread:$0]  (%p475_p11), %s183_s27, 128, %s185_s28, %s170_s10  }
  0xcd PF: > { %s196_s13 = sand.u32 1, %s401_s6   ;;  %p565_p7 = scmp.ge.s32.totalorder %s413_s9, 2 }
  0xce   : > { %s197_s14 = scalar_lea.sflag [#allocation4], %s196_s13 }
  0xcf   : > { %p276_p5 = pnand %p565_p7, %p479_p12 }
  0xd1   : > { %p277_p8 = pneg %p276_p5 }
  0xd3   : > { %396 = dma.done.wait (%p277_p8), %s197_s14, 128  }
  0xd4   : > { %398 = vsyncadd (%p277_p8), %s197_s14, 4294967168  ;;  %p14_p10 = scmp.ge.s32.totalorder %s450_s12, 4   ;;  %s566_s6 = smov %s405_s7 }
  0xd5   : > { %s567_s7 = smov %s409_s8  ;;  %s568_s8 = smov %s462_s15 }
  0xd6   : > { %s569_s9 = smov %s450_s12  ;;  %16 = sbr.rel (!%p14_p10) target bundleno = 5 (0x5), region = 69 }
  0xdb   :  { %203 = vsyncpa [#allocation3], 1 }
  0xdc   :  { %205 = vsyncpa [#allocation3 + $0x1], 1 }
  0xdd   :  { %206 = vsyncpa [#allocation4], 1 }
  0xde   :  { %208 = vsyncpa [#allocation4 + $0x1], 1 }

</bundles_post_ra>
